<compile_context>
chip_gen: v7x
topology: tpu7x:2x2x1
jax: 0.10.0
libtpu: 0.0.40
codegen_flags: <defaults>
</compile_context>

<pallas_src>
import functools

import jax
import jax.numpy as jnp
from jax.experimental import pallas as pl
from jax.experimental.pallas import tpu as pltpu

_LOG_CLAMP = -100.0        # PyTorch BCELoss clamps log terms at -100
_TARGET_TILE_R = 4096      # rows/tile: 4096*128*4B = 2 MiB per f32 input buffer


def _detect_num_cores():
    """TensorCores to shard the leading grid axis over (best effort)."""
    try:
        info = pltpu.get_tpu_info()
        for attr in ("num_cores", "core_count", "num_tensorcores",
                     "tensorcore_count"):
            v = getattr(info, attr, None)
            if isinstance(v, int) and 1 <= v <= 8:
                return v
    except Exception:
        pass
    # Fallback 2: uses both TCs on v7x; on single-TC chips (v5e/v6e) the
    # second "core" is just a serial grid half whose duplicate block is
    # skipped by the scalar guard, so this is harmless.
    return 2


_NUM_CORES = _detect_num_cores()


def _bce_pos_sum_kernel(x_ref, y_ref, out_ref, *, blocks_per_core, blocks_total):
    """Accumulate  y*log(x) + (1-y)*log(1-x)  (clamped) into an (8,128) block.

    The sign is folded in once by the wrapper (nll = -sum / n).
    """
    c = pl.program_id(0)          # core / output-block index ("parallel")
    i = pl.program_id(1)          # row-tile index within this core ("arbitrary")

    @pl.when(i == 0)
    def _():
        # Unconditional init so a core whose every block is a skipped
        # duplicate still produces zeros (never garbage VMEM).
        out_ref[...] = jnp.zeros_like(out_ref)

    # Scalar guard: the index_map clamps out-of-range blocks onto the last
    # real block, which holds REAL data -> must be skipped, not masked.
    @pl.when(c * blocks_per_core + i < blocks_total)
    def _():
        x = x_ref[...].astype(jnp.float32)
        y = y_ref[...].astype(jnp.float32)
        a = jnp.maximum(jnp.log(x), _LOG_CLAMP)          # log(x), clamped (EUP)
        b = jnp.maximum(jnp.log(1.0 - x), _LOG_CLAMP)    # log(1-x), clamped (EUP)
        pos = b + y * (a - b)                            # == y*a + (1-y)*b
        lanes = pos.shape[-1]
        # Layout-preserving fold: (tile_r,128) -> (tile_r/8, 8, 128) -> (8,128).
        # Pure VPU adds; the final cross-lane reduce is done once in the wrapper.
        out_ref[...] += pos.reshape(-1, 8, lanes).sum(axis=0)


def _bce_pos_sum_pallas(x2d, y2d, tile_r, blocks_total):
    """Sum of clamped  y*log(x)+(1-y)*log(1-x)  over the first
    blocks_total*tile_r rows of the (R, 128) slabs x2d / y2d."""
    R, C = x2d.shape
    assert C == 128 and tile_r % 8 == 0 and blocks_total >= 1
    assert blocks_total * tile_r <= R

    blocks_per_core = pl.cdiv(blocks_total, _NUM_CORES)
    max_block = blocks_total - 1

    def in_map(c, i):
        # Clamp to stay in bounds; clamped duplicates are skipped in-kernel.
        return (jnp.minimum(c * blocks_per_core + i, max_block), 0)

    kernel = functools.partial(
        _bce_pos_sum_kernel,
        blocks_per_core=blocks_per_core,
        blocks_total=blocks_total,
    )

    n_kern = blocks_total * tile_r * C
    cost = pl.CostEstimate(
        flops=8 * n_kern,
        transcendentals=2 * n_kern,
        bytes_accessed=2 * n_kern * x2d.dtype.itemsize + _NUM_CORES * 8 * C * 4,
    )

    out = pl.pallas_call(
        kernel,
        out_shape=jax.ShapeDtypeStruct((_NUM_CORES, 8, C), jnp.float32),
        grid_spec=pltpu.PrefetchScalarGridSpec(
            num_scalar_prefetch=0,
            grid=(_NUM_CORES, blocks_per_core),
            in_specs=[
                pl.BlockSpec((tile_r, C), in_map),
                pl.BlockSpec((tile_r, C), in_map),
            ],
            out_specs=pl.BlockSpec((None, 8, C), lambda c, i: (c, 0, 0)),
        ),
        compiler_params=pltpu.CompilerParams(
            # TODO(synk): verify on v7x that this leading axis really shards
            # across both TensorCores (pltpu.CORE_PARALLEL / core_map if not).
            dimension_semantics=("parallel", "arbitrary"),
            vmem_limit_bytes=48 * 1024 * 1024,
        ),
        cost_estimate=cost,
    )(x2d, y2d)

    # Single final cross-lane reduction (2*8*128 values) in plain XLA.
    return jnp.sum(out)


def _bce_pos_sum_ref(x, y):
    """Plain-JAX fold for the tiny ragged tail (same clamped algebra)."""
    x = x.astype(jnp.float32)
    y = y.astype(jnp.float32)
    a = jnp.maximum(jnp.log(x), _LOG_CLAMP)
    b = jnp.maximum(jnp.log(1.0 - x), _LOG_CLAMP)
    return jnp.sum(b + y * (a - b))


def unweighted_bce_loss(probs, labels, params=None):
    """Mirrors UnWeightedBCELoss.forward: returns (nll, 0, 0, 0, unweighted_nll)."""
    n = probs.size
    x = jnp.ravel(probs)      # inputs kept in native storage dtype (bf16 ok);
    y = jnp.ravel(labels)     # cast to f32 happens per-tile inside the kernel.

    R = n // 128              # full 128-lane rows available
    if R >= 8:
        tile_r = _TARGET_TILE_R if R >= _TARGET_TILE_R else (R // 8) * 8
        blocks_total = R // tile_r
    else:
        tile_r = 0
        blocks_total = 0
    n_kern = blocks_total * tile_r * 128   # elements covered by the kernel

    total_pos = jnp.float32(0.0)

    if n_kern > 0:
        if n % 128 == 0:
            x2d = x.reshape(R, 128)        # copy-free reshape
            y2d = y.reshape(R, 128)
        else:
            # TODO(synk): avoid this prefix copy with a 1-D manual-DMA tail
            # kernel; only hit when the flat size is not a multiple of 128.
            x2d = jax.lax.slice(x, (0,), (R * 128,)).reshape(R, 128)
            y2d = jax.lax.slice(y, (0,), (R * 128,)).reshape(R, 128)
        total_pos = total_pos + _bce_pos_sum_pallas(x2d, y2d, tile_r, blocks_total)

    if n_kern < n:
        # Ragged remainder: < tile_r rows plus a < 128-element flat tail.
        xt = x if n_kern == 0 else x[n_kern:]
        yt = y if n_kern == 0 else y[n_kern:]
        total_pos = total_pos + _bce_pos_sum_ref(xt, yt)

    nll = -total_pos / jnp.float32(n)
    zero = jnp.array(0, dtype=jnp.int32)
    unweighted_nll = nll      # mean of a scalar is itself
    return (nll, zero, zero, zero, unweighted_nll)


if __name__ == "__main__":
    key = jax.random.PRNGKey(0)
    k1, k2 = jax.random.split(key)
    B, C, H, W = 2, 4, 16, 16  # NCHW, as in the PyTorch convention
    probs = jax.nn.sigmoid(jax.random.normal(k1, (B, C, H, W), jnp.float32))
    labels = (jax.random.uniform(k2, (B, C, H, W)) > 0.5).astype(jnp.float32)
    params = jnp.zeros((4,), jnp.float32)  # unused, mirrors the signature

    out = unweighted_bce_loss(probs, labels, params)
    jax.block_until_ready(out)

    # Reference check in plain JAX (BCELoss with reduction='none', then mean).
    xr = probs.astype(jnp.float32)
    yr = labels.astype(jnp.float32)
    ref = jnp.mean(-(yr * jnp.maximum(jnp.log(xr), -100.0)
                     + (1.0 - yr) * jnp.maximum(jnp.log(1.0 - xr), -100.0)))
    assert jnp.allclose(out[0], ref, rtol=1e-5, atol=1e-6), (out[0], ref)
    assert jnp.allclose(out[4], ref, rtol=1e-5, atol=1e-6)
    assert out[1] == 0 and out[2] == 0 and out[3] == 0
    print("KERNEL_OK")
</pallas_src>

<mosaic_0001>
module attributes {stable_mosaic.version = 11 : i64} {
  func.func @_bce_pos_sum_kernel(%arg0: i32, %arg1: i32, %arg2: memref<16x128xf32, #tpu.memory_space<vmem>>, %arg3: memref<16x128xf32, #tpu.memory_space<vmem>>, %arg4: memref<1x8x128xf32, #tpu.memory_space<vmem>>) attributes {dimension_semantics = [#tpu.dimension_semantics<parallel>, #tpu.dimension_semantics<arbitrary>], iteration_bounds = array<i64: 2, 1>, scalar_prefetch = 0 : i64, scratch_operands = 0 : i64, tpu.core_type = #tpu.core_type<tc>, window_params = [{transform_indices = @transform_0, window_bounds = array<i64: 16, 128>}, {transform_indices = @transform_1, window_bounds = array<i64: 16, 128>}, {transform_indices = @transform_2, window_bounds = array<i64: 1, 8, 128>}]} {
    %c0_i32 = arith.constant 0 : i32
    %0 = arith.cmpi eq, %arg1, %c0_i32 : i32
    %1 = arith.extui %0 : i1 to i32
    %c0_i32_0 = arith.constant 0 : i32
    %2 = arith.cmpi ne, %1, %c0_i32_0 : i32
    scf.if %2 {
      %cst = arith.constant 0.000000e+00 : f32
      %8 = vector.broadcast %cst : f32 to vector<8x128xf32>
      %c0 = arith.constant 0 : index
      %c0_3 = arith.constant 0 : index
      %c0_4 = arith.constant 0 : index
      %9 = vector.load %arg4[%c0, %c0_3, %c0_4] : memref<1x8x128xf32, #tpu.memory_space<vmem>>, vector<1x8x128xf32>
      %10 = vector.shape_cast %9 : vector<1x8x128xf32> to vector<8x128xf32>
      %11 = vector.shape_cast %8 : vector<8x128xf32> to vector<1x8x128xf32>
      tpu.vector_store %arg4[%c0, %c0_3, %c0_4], %11 {strides = array<i32>} : memref<1x8x128xf32, #tpu.memory_space<vmem>>, vector<1x8x128xf32>,
    } else {
    }
    %c1_i32 = arith.constant 1 : i32
    %3 = arith.muli %arg0, %c1_i32 : i32
    %4 = arith.addi %3, %arg1 : i32
    %c1_i32_1 = arith.constant 1 : i32
    %5 = arith.cmpi slt, %4, %c1_i32_1 : i32
    %6 = arith.extui %5 : i1 to i32
    %c0_i32_2 = arith.constant 0 : i32
    %7 = arith.cmpi ne, %6, %c0_i32_2 : i32
    scf.if %7 {
      %c0 = arith.constant 0 : index
      %c0_3 = arith.constant 0 : index
      %8 = vector.load %arg2[%c0, %c0_3] : memref<16x128xf32, #tpu.memory_space<vmem>>, vector<16x128xf32>
      %c0_4 = arith.constant 0 : index
      %c0_5 = arith.constant 0 : index
      %9 = vector.load %arg3[%c0_4, %c0_5] : memref<16x128xf32, #tpu.memory_space<vmem>>, vector<16x128xf32>
      %10 = math.log %8 : vector<16x128xf32>
      %cst = arith.constant -1.000000e+02 : f32
      %11 = vector.broadcast %cst : f32 to vector<16x128xf32>
      %12 = arith.maximumf %10, %11 : vector<16x128xf32>
      %cst_6 = arith.constant 1.000000e+00 : f32
      %13 = vector.broadcast %cst_6 : f32 to vector<16x128xf32>
      %14 = arith.subf %13, %8 : vector<16x128xf32>
      %15 = math.log %14 : vector<16x128xf32>
      %cst_7 = arith.constant -1.000000e+02 : f32
      %16 = vector.broadcast %cst_7 : f32 to vector<16x128xf32>
      %17 = arith.maximumf %15, %16 : vector<16x128xf32>
      %18 = arith.subf %12, %17 : vector<16x128xf32>
      %19 = arith.mulf %9, %18 : vector<16x128xf32>
      %20 = arith.addf %17, %19 : vector<16x128xf32>
      %c0_8 = arith.constant 0 : index
      %c0_9 = arith.constant 0 : index
      %c0_10 = arith.constant 0 : index
      %21 = vector.load %arg4[%c0_8, %c0_9, %c0_10] : memref<1x8x128xf32, #tpu.memory_space<vmem>>, vector<1x8x128xf32>
      %22 = vector.shape_cast %21 : vector<1x8x128xf32> to vector<8x128xf32>
      %23 = vector.shape_cast %20 : vector<16x128xf32> to vector<2x8x128xf32>
      %cst_11 = arith.constant dense<0.000000e+00> : vector<8x128xf32>
      %24 = vector.multi_reduction <add>, %23, %cst_11 [0] : vector<2x8x128xf32> to vector<8x128xf32>
      %25 = arith.addf %22, %24 : vector<8x128xf32>
      %c0_12 = arith.constant 0 : index
      %c0_13 = arith.constant 0 : index
      %c0_14 = arith.constant 0 : index
      %26 = vector.load %arg4[%c0_12, %c0_13, %c0_14] : memref<1x8x128xf32, #tpu.memory_space<vmem>>, vector<1x8x128xf32>
      %27 = vector.shape_cast %26 : vector<1x8x128xf32> to vector<8x128xf32>
      %28 = vector.shape_cast %25 : vector<8x128xf32> to vector<1x8x128xf32>
      tpu.vector_store %arg4[%c0_12, %c0_13, %c0_14], %28 {strides = array<i32>} : memref<1x8x128xf32, #tpu.memory_space<vmem>>, vector<1x8x128xf32>,
    } else {
    }
    return
  }
  func.func @transform_0(%arg0: i32, %arg1: i32) -> (i32, i32) {
    %c1_i32 = arith.constant 1 : i32
    %0 = arith.muli %arg0, %c1_i32 : i32
    %1 = arith.addi %0, %arg1 : i32
    %c0_i32 = arith.constant 0 : i32
    %2 = arith.minsi %1, %c0_i32 : i32
    %c0_i32_0 = arith.constant 0 : i32
    %c0_i32_1 = arith.constant 0 : i32
    return %2, %c0_i32_0 : i32, i32
  }
  func.func @transform_1(%arg0: i32, %arg1: i32) -> (i32, i32) {
    %c1_i32 = arith.constant 1 : i32
    %0 = arith.muli %arg0, %c1_i32 : i32
    %1 = arith.addi %0, %arg1 : i32
    %c0_i32 = arith.constant 0 : i32
    %2 = arith.minsi %1, %c0_i32 : i32
    %c0_i32_0 = arith.constant 0 : i32
    %c0_i32_1 = arith.constant 0 : i32
    return %2, %c0_i32_0 : i32, i32
  }
  func.func @transform_2(%arg0: i32, %arg1: i32) -> (i32, i32, i32) {
    %c0_i32 = arith.constant 0 : i32
    %c0_i32_0 = arith.constant 0 : i32
    %c0_i32_1 = arith.constant 0 : i32
    return %arg0, %c0_i32, %c0_i32_0 : i32, i32, i32
  }
}

</mosaic_0001>

<bundles_post_ra>
// kernel: tpu_custom_call.1
= control target key start
LH: loop header
LB: loop body
LE: loop exit
PB: predicated region body
PF: predicated region fallthrough
CT: control target
= control target key end

     0   :  { %7 = vsyncpa [#allocation3], 0  ;;  %s918_s0 = inlined_call_operand.hbm [shape: f32[16,128], index: 0, kind: input, shape index: {}]   ;;  %s919_s1 = inlined_call_operand.hbm [shape: f32[16,128], index: 1, kind: input, shape index: {}]   ;;  %s920_s2 = inlined_call_operand.hbm [shape: f32[2,8,128], index: 2, kind: output, shape index: {}]  }
   0x1   :  { %9 = vsyncpa [#allocation3 + $0x1], 0 }
   0x2   :  { %10 = vsyncpa [#allocation6], 0 }
   0x3   :  { %12 = vsyncpa [#allocation6 + $0x1], 0 }
   0x4   :  { %13 = vsyncpa [#allocation4], 0 }
   0x5   :  { %15 = vsyncpa [#allocation4 + $0x1], 0  ;;  %s706_s9 = smov 0   ;;  %s708_s10 = smov 0  }
   0x6   :  { %s710_s11 = smov 0   ;;  %s712_s12 = smov 0  }
   0x7   :  { %s714_s13 = smov 0   ;;  %s716_s14 = smov 0  }
   0x8   :  { %s718_s15 = smov 0   ;;  %s720_s16 = smov 0  }
   0x9 LB: > { %s393_s17 = sadd.s32 4294967295, %s683_s16   ;;  %s394_s18 = sadd.s32 4294967294, %s683_s16   ;;  %s683_s16 = sphi %s720_s16, %s21_s16   ;;  %s679_s15 = sphi %s718_s15, %s939_s15   ;;  %s675_s14 = sphi %s716_s14, %s938_s14   ;;  %s671_s13 = sphi %s714_s13, %s908_s13   ;;  %s667_s12 = sphi %s712_s12, %s937_s12   ;;  %s663_s11 = sphi %s710_s11, %s936_s11   ;;  %s659_s10 = sphi %s708_s10, %s935_s10   ;;  %s655_s9 = sphi %s706_s9, %s934_s9  }
   0xa   : > { %s33_s19 = sadd.s32 1, %s679_s15  ;;  %p652_p1 = scmp.ne.s32.totalorder %s671_s13, 0 }
   0xb   : > { %p35_p0 = scmp.ge.s32.totalorder %s33_s19, 2  ;;  %p54_p2 = scmp.eq.s32.totalorder %s683_s16, 0 }
   0xc   : > { %p59_p3 = scmp.ne.s32.totalorder %s671_s13, %s667_s12  ;;  %p60_p5 = scmp.eq.s32.totalorder %s393_s17, 0 }
   0xd   : > { %s941_s19 = smov (%p35_p0, %s33_s19), 0  ;;  %p752_p4 = por %p652_p1, %p54_p2 }
   0xe   : > { %p756_p6 = por %p60_p5, %p59_p3  ;;  %s101_s22 = ssub.s32 %s679_s15, %s941_s19 }
   0xf   : > { %p102_p7 = scmp.eq.s32.totalorder %s101_s22, 0  ;;  %s104_s23 = sadd.s32 1, %s663_s11 }
  0x10   : > { %s924_s21 = scalar_select %p756_p6, 1, 0 }
  0x11   : > { %s764_s24 = scalar_select %p102_p7, %s663_s11, %s104_s23  }
  0x12   : > { %p114_p8 = scmp.ne.s32.totalorder %s663_s11, %s659_s10  ;;  %p115_p9 = scmp.eq.s32.totalorder %s393_s17, 1 }
  0x13   : > { %p120_p10 = scmp.ne.s32.totalorder %s659_s10, %s655_s9  ;;  %p121_p11 = scmp.eq.s32.totalorder %s394_s18, 1 }
  0x14   : > { %p770_p12 = por %p115_p9, %p114_p8  ;;  %p431_p1 = scmp.lt.s32.totalorder %s683_s16, 2 }
  0x15   : > { %p775_p0 = por %p121_p11, %p120_p10  ;;  %s685_s27 = smov [#allocation2]  }
  0x16   : > { %s925_s25 = scalar_select %p770_p12, 1, 0 }
  0x17   : > { %s926_s26 = scalar_select %p775_p0, 1, 0 }
  0x18   : > { %s155_s28 = sshll.u32 %s685_s27, 4  ;;  %p782_p2 = pnand %p431_p1, %p752_p4  ;;  %s156_s28 = int_to_ptr.vmem [resolvable:$true] %s155_s28 }
  0x19   : > { %s516_s4 = scalar_lea.hbm %s918_s0, 256 }
  0x1a   : > { %p517_p3 = scmp.ne.s32.totalorder %s918_s0, %s516_s4  ;;  %p518_p5 = pneg %p782_p2 }
  0x1b   : > { %p523_p8 = scmp.lt.u32.totalorder %s516_s4, %s516_s4  ;;  %p525_p9 = scmp.lt.u32.totalorder %s516_s4, %s918_s0 }
  0x1c   : > { %p519_p7 = pnand %p518_p5, %p517_p3 }
  0x1d   : > { %p526_p10 = por %p525_p9, %p523_p8 }
  0x1e   : > { %p520_p4 = pneg %p519_p7 }
  0x20   : > { %p527_p11 = pnand %p526_p10, %p520_p4 }
  0x22   : > { %530 = shalt.err (!%p527_p11)
}
  0x23   : > { %s531_s12 = scalar_lea.vmem %s156_s28, 256  ;;  %s538_s17 = scalar_lea.vmem %s156_s28, 512 }
  0x24   : > { %p532_p1 = scmp.ne.s32.totalorder %s156_s28, %s531_s12  ;;  %p539_p12 = scmp.lt.s32.totalorder %s156_s28, %s156_s28 }
  0x25   : > { %p540_p6 = scmp.lt.s32.totalorder %s538_s17, %s531_s12 }
  0x26   : > { %p534_p13 = pnand %p532_p1, %p518_p5 }
  0x27   : > { %p541_p3 = por %p540_p6, %p539_p12 }
  0x28   : > { %p535_p0 = pneg %p534_p13 }
  0x2a   : > { %p542_p7 = pnand %p541_p3, %p535_p0 }
  0x2c   : > { %545 = shalt.err (!%p542_p7)
}
  0x2d   : > { %s686_s18 = smov 128   ;;  %s687_s20 = smov 8  }
  0x2e   : > { %423 = dma.hbm_to_vmem [thread:$0]  (!%p782_p2), %s918_s0, 256, %s156_s28, [#allocation3], %s686_s18, %s686_s18, %s687_s20  }
  0x2f   : > { %p403_p13 = scmp.ge.s32.totalorder %s683_s16, 1  ;;  %p187_p4 = scmp.lt.s32.totalorder %s683_s16, 3 }
  0x30   : > { %s688_s30 = smov [#allocation5]   ;;  %s546_s6 = scalar_lea.hbm %s919_s1, 256 }
  0x31   : > { %p813_p8 = pnand %p403_p13, %p187_p4  ;;  %s179_s3 = sshll.u32 %s688_s30, 4  ;;  %s180_s3 = int_to_ptr.vmem [resolvable:$true] %s179_s3 }
  0x32   : > { %p547_p6 = scmp.ne.s32.totalorder %s919_s1, %s546_s6  ;;  %p553_p9 = scmp.lt.u32.totalorder %s546_s6, %s546_s6 }
  0x33   : > { %s928_s27 = scalar_select %p813_p8, 1, 0 }
  0x34   : > { %p549_p12 = pnand %p547_p6, %p518_p5  ;;  %p555_p10 = scmp.lt.u32.totalorder %s546_s6, %s919_s1 }
  0x36   : > { %p550_p0 = pneg %p549_p12  ;;  %p556_p11 = por %p555_p10, %p553_p9 }
  0x38   : > { %p557_p1 = pnand %p556_p11, %p550_p0 }
  0x3a   : > { %560 = shalt.err (!%p557_p1)
}
  0x3b   : > { %s561_s17 = scalar_lea.vmem %s180_s3, 256  ;;  %s568_s22 = scalar_lea.vmem %s180_s3, 512 }
  0x3c   : > { %p562_p3 = scmp.ne.s32.totalorder %s180_s3, %s561_s17  ;;  %p569_p4 = scmp.lt.s32.totalorder %s180_s3, %s180_s3 }
  0x3d   : > { %p570_p8 = scmp.lt.s32.totalorder %s568_s22, %s561_s17 }
  0x3e   : > { %p564_p7 = pnand %p562_p3, %p518_p5 }
  0x3f   : > { %p571_p6 = por %p570_p8, %p569_p4 }
  0x40   : > { %p565_p13 = pneg %p564_p7 }
  0x42   : > { %p572_p12 = pnand %p571_p6, %p565_p13 }
  0x44   : > { %575 = shalt.err (!%p572_p12)
}
  0x45   : > { %426 = dma.hbm_to_vmem [thread:$0]  (!%p782_p2), %s919_s1, 256, %s180_s3, [#allocation6], %s686_s18, %s686_s18, %s687_s20  }
  0x46   : > { %p929_p0 = scmp.ne.s32.totalorder %s928_s27, 0 }
  0x47   : > { %s193_s4 = sand.u32 (!%p929_p0), 1, %s671_s13   ;;  %p930_p5 = scmp.ne.s32.totalorder (!%p929_p0), %s924_s21, 0 }
  0x48   : > { %191 = sbr.rel (%p929_p0) target bundleno = 138 (0x8a), region = 28  ;;  %s404_s5 = sshll.u32 (!%p929_p0), %s193_s4, 4 }
  0x49   : > { %s194_s6 = scalar_lea.sflag (!%p929_p0), [#allocation3], %s193_s4  ;;  %s197_s7 = scalar_lea.vmem (!%p929_p0), [#allocation2], %s404_s5 }
  0x4f   : > { %641 = dma.done.wait (%p930_p5), %s194_s6, 256  }
  0x50   : > { %643 = vsyncadd (%p930_p5), %s194_s6, 4294967040  ;;  %s203_s29 = scalar_lea.sflag [#allocation6], %s193_s4  ;;  %s847_s8 = scalar_lea.vmem [#allocation5], %s404_s5 }
  0x51   : > { %645 = dma.done.wait (%p930_p5), %s203_s29, 256  }
  0x52   : > { %647 = vsyncadd (%p930_p5), %s203_s29, 4294967040  ;;  %s229_s18 = sand.u32 1, %s659_s10   ;;  %v689_v0 = vmov 0.0   ;;  %p407_p2 = scmp.ge.s32.totalorder %s675_s14, 1 }
  0x53   : > { %s406_s20 = sshll.u32 %s229_s18, 3  ;;  %v250_v1 = vld [vmem:[%s197_s7] sm:$0xff] (!%p407_p2)  ;;  %v251_v2 = vld [vmem:[%s197_s7 + $0x8] sm:$0xff] (!%p407_p2) }
  0x54   : > { %s856_s27 = scalar_lea.vmem [#allocation7], %s406_s20  ;;  %249 = sbr.rel (%p407_p2) target bundleno = 113 (0x71), region = 44  ;;  %508 = vlog2.f32 (!%p407_p2), %v250_v1  ;;  %v260_v3 = vsub.f32 (!%p407_p2), 1.0, %v250_v1  ;;  %v261_v4 = vsub.f32 (!%p407_p2), 1.0, %v251_v2  ;;  %v252_v16 = vld [vmem:[%s847_s8] sm:$0xff] (!%p407_p2)  ;;  %v253_v18 = vld [vmem:[%s847_s8 + $0x8] sm:$0xff] (!%p407_p2) }
  0x55   : > { %244 = vst [vmem:[%s856_s27] sm:$0xff] %v689_v0  ;;  %510 = vlog2.f32 (!%p407_p2), %v251_v2 }
  0x56   : > { %512 = vlog2.f32 (!%p407_p2), %v260_v3 }
  0x57   : > { %514 = vlog2.f32 (!%p407_p2), %v261_v4 }
  0x5c   : > { %v274_v25 = vld [vmem:[%s856_s27] sm:$0xff] }
  0x5e   : > { %v509_v5 = vpop.eup %508 }
  0x5f   : > { %v511_v6 = vpop.eup %510  ;;  %v255_v7 = vmul.f32 0.6931472, %v509_v5 }
  0x60   : > { %v513_v8 = vpop.eup %512  ;;  %v257_v9 = vmul.f32 0.6931472, %v511_v6 }
  0x61   : > { %v515_v10 = vpop.eup %514  ;;  %v258_v11 = vmax.f32 %v255_v7, -100.0  ;;  %v263_v12 = vmul.f32 0.6931472, %v513_v8 }
  0x62   : > { %v259_v13 = vmax.f32 %v257_v9, -100.0  ;;  %v265_v14 = vmul.f32 0.6931472, %v515_v10 }
  0x63   : > { %v266_v15 = vmax.f32 %v263_v12, -100.0 }
  0x64   : > { %v267_v17 = vmax.f32 %v265_v14, -100.0 }
  0x65   : > { %v268_v19 = vsub.f32 %v258_v11, %v266_v15 }
  0x66   : > { %v269_v20 = vsub.f32 %v259_v13, %v267_v17 }
  0x67   : > { %v270_v21 = vmul.f32 %v268_v19, %v252_v16 }
  0x68   : > { %v271_v22 = vmul.f32 %v269_v20, %v253_v18 }
  0x69   : > { %v272_v23 = vadd.f32 %v270_v21, %v266_v15 }
  0x6a   : > { %v273_v24 = vadd.f32 %v271_v22, %v267_v17 }
  0x6c   : > { %v275_v26 = vadd.f32 %v273_v24, %v272_v23 }
  0x6e   : > { %v276_v27 = vadd.f32 %v275_v26, %v274_v25 }
  0x70   : > { %277 = vst [vmem:[%s856_s27] sm:$0xff] %v276_v27 }
  0x71 PF: > { %s409_s21 = sshll.u32 %s675_s14, 7  ;;  %s292_s17 = sshll.u32 %s856_s27, 4  ;;  %s293_s17 = int_to_ptr.vmem [resolvable:$true] %s292_s17 }
  0x72   : > { %s868_s12 = scalar_lea.hbm %s920_s2, %s409_s21  ;;  %s279_s22 = scalar_lea.sflag [#allocation4], %s229_s18 }
  0x73   : > { %s576_s23 = scalar_lea.vmem %s293_s17, 128  ;;  %p931_p9 = scmp.ne.s32.totalorder %s925_s25, 0 }
  0x74   : > { %p577_p8 = scmp.ne.s32.totalorder %s293_s17, %s576_s23  ;;  %s690_s30 = smov [#allocation7]  }
  0x75   : > { %s580_s4 = sshll.u32 %s690_s30, 4  ;;  %s581_s4 = int_to_ptr.vmem [resolvable:$false] %s580_s4 }
  0x76   : > { %p578_p10 = pnand %p577_p8, %p931_p9  ;;  %s582_s5 = scalar_lea.vmem %s581_s4, 256 }
  0x77   : > { %p583_p1 = scmp.lt.s32.totalorder %s293_s17, %s581_s4  ;;  %p584_p3 = scmp.lt.s32.totalorder %s582_s5, %s576_s23 }
  0x78   : > { %p579_p11 = pneg %p578_p10 }
  0x79   : > { %p585_p7 = por %p584_p3, %p583_p1 }
  0x7b   : > { %p586_p13 = pnand %p585_p7, %p579_p11 }
  0x7d   : > { %589 = shalt.err (!%p586_p13)
}
  0x7e   : > { %s590_s14 = scalar_lea.hbm %s868_s12, 128  ;;  %s594_s29 = scalar_lea.hbm %s920_s2, 256 }
  0x7f   : > { %p591_p4 = scmp.ne.s32.totalorder %s868_s12, %s590_s14  ;;  %p595_p0 = scmp.lt.u32.totalorder %s868_s12, %s920_s2 }
  0x80   : > { %p596_p5 = scmp.lt.u32.totalorder %s594_s29, %s590_s14  ;;  %p598_p8 = scmp.lt.u32.totalorder %s590_s14, %s868_s12 }
  0x81   : > { %p592_p6 = pnand %p591_p4, %p931_p9 }
  0x82   : > { %p597_p2 = por %p596_p5, %p595_p0 }
  0x83   : > { %p593_p12 = pneg %p592_p6 }
  0x84   : > { %p599_p10 = por %p598_p8, %p597_p2 }
  0x86   : > { %p600_p11 = pnand %p599_p10, %p593_p12 }
  0x88   : > { %603 = shalt.err (!%p600_p11)
}
  0x89   : > { %418 = dma.vmem_to_hbm [thread:$0]  (%p931_p9), %s293_s17, 128, %s868_s12, %s279_s22  }
  0x8a PF: > { %s304_s20 = sand.u32 1, %s655_s9   ;;  %p932_p1 = scmp.ne.s32.totalorder %s926_s26, 0 }
  0x8b   : > { %p933_p3 = scmp.ge.s32.totalorder %s683_s16, 2  ;;  %s305_s27 = scalar_lea.sflag [#allocation4], %s304_s20 }
  0x8d   : > { %p428_p7 = pnand %p933_p3, %p932_p1 }
  0x8f   : > { %649 = dma.done.wait (!%p428_p7), %s305_s27, 128  }
  0x90   : > { %651 = vsyncadd (!%p428_p7), %s305_s27, 4294967168  ;;  %s21_s16 = sadd.s32 1, %s683_s16   ;;  %s934_s9 = smov %s659_s10 }
  0x91   : > { %p18_p13 = scmp.ge.s32.totalorder %s21_s16, 4   ;;  %s935_s10 = smov %s663_s11 }
  0x92   : > { %s936_s11 = smov %s764_s24  ;;  %s937_s12 = smov %s671_s13 }
  0x93   : > { %s908_s13 = smov 0   ;;  %s938_s14 = smov %s679_s15 }
  0x94   : > { %s939_s15 = smov %s941_s19  ;;  %20 = sbr.rel (!%p18_p13) target bundleno = 9 (0x9), region = 94 }
  0x9b   :  { %310 = vsyncpa [#allocation3], 1 }
  0x9c   :  { %312 = vsyncpa [#allocation3 + $0x1], 1 }
  0x9d   :  { %313 = vsyncpa [#allocation6], 1 }
  0x9e   :  { %315 = vsyncpa [#allocation6 + $0x1], 1 }
  0x9f   :  { %316 = vsyncpa [#allocation4], 1 }
  0xa0   :  { %318 = vsyncpa [#allocation4 + $0x1], 1 }

</bundles_post_ra>
